<compile_context>
chip_gen: v7x
topology: tpu7x:2x2x1
jax: 0.10.0
libtpu: 0.0.40
codegen_flags: <defaults>
</compile_context>

<pallas_src>
import jax
import jax.numpy as jnp
from jax.experimental import pallas as pl
from jax.experimental.pallas import tpu as pltpu

HIDDEN_SIZE = 2
INPUT_SIZE = 5
NUM_CLASSES = 1
NUM_LAYERS = 1          # single-layer RNN (matches the module config)
FC1_SIZE = 128


def _make_rnn1_kernel(B: int, T: int):
    I, H = INPUT_SIZE, HIDDEN_SIZE

    def kernel(x_ref, wih_ref, whh_ref, b_ref, w1_ref, b1_ref, w2_ref, b2_ref,
               out_ref, px_ref):
        # ---- hoisted input projection (independent of h) --------------------
        # px[b*T + t, :] = x[b, t, :] @ W_ih^T + (b_ih + b_hh)
        # K=5 / N=2 is far below MXU granularity -> I rank-1 VPU broadcasts.
        x2 = x_ref[...]                                  # (B*T, I)
        wih = wih_ref[...]                               # (I, H)
        px = x2[:, 0:1] * wih[0:1, :]
        for i in range(1, I):
            px = px + x2[:, i:i + 1] * wih[i:i + 1, :]
        px = px + b_ref[...]                             # fold RNN bias once
        px_ref[...] = px                                 # park for per-step reads

        # ---- recurrence: only h @ W_hh + tanh on the serial path -------------
        whh = whh_ref[...]                               # (H, H) == W_hh^T
        # rows {b*T + t} of px_ref are the (B, H) pre-activation of step t
        h = jnp.tanh(px_ref[pl.ds(0, B, stride=T), :])   # t = 0 (h_0 == 0)
        for t in range(1, T):                            # fully unrolled
            rec = h[:, 0:1] * whh[0:1, :]                # VPU FMAs, no MXU
            for k in range(1, H):
                rec = rec + h[:, k:k + 1] * whh[k:k + 1, :]
            h = jnp.tanh(px_ref[pl.ds(t, B, stride=T), :] + rec)

        # ---- head: relu -> fc_1 -> relu -> fc (all VPU/XLU) ------------------
        hr = jnp.maximum(h, 0.0)                         # relu(hn)
        w1 = w1_ref[...]                                 # (H, 128)
        z1 = b1_ref[...] + hr[:, 0:1] * w1[0:1, :]
        for k in range(1, H):
            z1 = z1 + hr[:, k:k + 1] * w1[k:k + 1, :]
        a1 = jnp.maximum(z1, 0.0)                        # (B, 128)
        # fc: (B,128) @ (128,1) as lane multiply + lane reduce + scalar bias
        res = jnp.sum(a1 * w2_ref[...], axis=-1, keepdims=True) + b2_ref[0, 0]
        out_ref[...] = res.astype(out_ref.dtype)

    return kernel


def rnn1_forward(x_btI, params):
    """x_btI: (B, T, INPUT_SIZE) float32 (PyTorch batch_first convention)."""
    wih, whh, b, w1, b1, w2, b2 = params
    B, T, I = x_btI.shape
    assert I == INPUT_SIZE and T >= 1

    # Row-major flatten only -- free; no transpose HLO is materialized.
    x2 = x_btI.reshape(B * T, I)

    vmem = pl.BlockSpec(memory_space=pltpu.MemorySpace.VMEM)
    smem = pl.BlockSpec(memory_space=pltpu.MemorySpace.SMEM)

    # Single program: total resident footprint is a few KiB, well under VMEM
    # on v5e/v6e/v7x, so no grid/tiling is needed.  NOTE: if B ever grows
    # beyond toy size, add a batch grid with dimension_semantics=("parallel",)
    # so v7x can shard across its two TensorCores.
    return pl.pallas_call(
        _make_rnn1_kernel(B, T),
        out_shape=jax.ShapeDtypeStruct((B, NUM_CLASSES), jnp.float32),
        in_specs=[vmem, vmem, vmem, vmem, vmem, vmem, vmem, smem],
        out_specs=vmem,
        scratch_shapes=[pltpu.VMEM((B * T, HIDDEN_SIZE), jnp.float32)],
    )(x2, wih, whh, b, w1, b1, w2, b2)


def init_params(key):
    """Deterministic params; PyTorch-like uniform fan-in init.

    W_ih / W_hh / fc_1 weights are stored pre-transposed as (in, out) so the
    kernel computes act @ W; fc.weight keeps its natural (1, 128) row shape
    for the lane-reduce formulation of the final projection.
    """
    ks = jax.random.split(key, 8)

    def u(k, shape, bound):
        return jax.random.uniform(k, shape, jnp.float32, -bound, bound)

    s_rnn = 1.0 / jnp.sqrt(HIDDEN_SIZE)
    s_fc1 = 1.0 / jnp.sqrt(HIDDEN_SIZE)
    s_fc2 = 1.0 / jnp.sqrt(FC1_SIZE)
    wih = u(ks[0], (INPUT_SIZE, HIDDEN_SIZE), s_rnn)      # W_ih^T
    whh = u(ks[1], (HIDDEN_SIZE, HIDDEN_SIZE), s_rnn)     # W_hh^T
    b_ih = u(ks[2], (1, HIDDEN_SIZE), s_rnn)
    b_hh = u(ks[3], (1, HIDDEN_SIZE), s_rnn)
    b = b_ih + b_hh                                       # combined RNN bias
    w1 = u(ks[4], (HIDDEN_SIZE, FC1_SIZE), s_fc1)         # fc_1.weight^T
    b1 = u(ks[5], (1, FC1_SIZE), s_fc1)
    w2 = u(ks[6], (NUM_CLASSES, FC1_SIZE), s_fc2)         # fc.weight (1, 128) row
    b2 = u(ks[7], (1, NUM_CLASSES), s_fc2)                # (1, 1), lives in SMEM
    return (wih, whh, b, w1, b1, w2, b2)


def _reference(x_btI, params):
    """Pure-JAX reference of the same forward pass (for sanity checking)."""
    wih, whh, b, w1, b1, w2, b2 = params
    B, T, _ = x_btI.shape
    h = jnp.zeros((B, HIDDEN_SIZE), jnp.float32)
    for t in range(T):
        h = jnp.tanh(x_btI[:, t, :] @ wih + h @ whh + b)
    out = jnp.maximum(h, 0.0)
    out = jnp.maximum(out @ w1 + b1, 0.0)
    return out @ w2.T + b2


if __name__ == "__main__":
    key = jax.random.PRNGKey(0)
    k_x, k_p = jax.random.split(key)

    batch, seq_len = 4, 8
    x = jax.random.normal(k_x, (batch, seq_len, INPUT_SIZE), jnp.float32)
    params = init_params(k_p)

    out = rnn1_forward(x, params)
    out = jax.block_until_ready(out)

    ref = _reference(x, params)
    assert out.shape == (batch, NUM_CLASSES)
    assert jnp.allclose(out, ref, atol=1e-5, rtol=1e-5)

    print("KERNEL_OK")
</pallas_src>

<mosaic_0001>
module attributes {stable_mosaic.version = 11 : i64} {
  func.func @kernel(%arg0: memref<32x5xf32, #tpu.memory_space<vmem>>, %arg1: memref<5x2xf32, #tpu.memory_space<vmem>>, %arg2: memref<2x2xf32, #tpu.memory_space<vmem>>, %arg3: memref<1x2xf32, #tpu.memory_space<vmem>>, %arg4: memref<2x128xf32, #tpu.memory_space<vmem>>, %arg5: memref<1x128xf32, #tpu.memory_space<vmem>>, %arg6: memref<1x128xf32, #tpu.memory_space<vmem>>, %arg7: memref<1x1xf32, #tpu.memory_space<smem>>, %arg8: memref<4x1xf32, #tpu.memory_space<vmem>>, %arg9: memref<32x2xf32, #tpu.memory_space<vmem>>) attributes {dimension_semantics = [], scalar_prefetch = 0 : i64, scratch_operands = 1 : i64, tpu.core_type = #tpu.core_type<tc>} {
    %c0 = arith.constant 0 : index
    %c0_0 = arith.constant 0 : index
    %0 = vector.load %arg0[%c0, %c0_0] : memref<32x5xf32, #tpu.memory_space<vmem>>, vector<32x5xf32>
    %c0_1 = arith.constant 0 : index
    %c0_2 = arith.constant 0 : index
    %1 = vector.load %arg1[%c0_1, %c0_2] : memref<5x2xf32, #tpu.memory_space<vmem>>, vector<5x2xf32>
    %2 = vector.extract_strided_slice %0 {offsets = [0, 0], sizes = [32, 1], strides = [1, 1]} : vector<32x5xf32> to vector<32x1xf32>
    %3 = vector.extract_strided_slice %1 {offsets = [0, 0], sizes = [1, 2], strides = [1, 1]} : vector<5x2xf32> to vector<1x2xf32>
    %4 = vector.broadcast %2 : vector<32x1xf32> to vector<32x2xf32>
    %5 = vector.broadcast %3 : vector<1x2xf32> to vector<32x2xf32>
    %6 = arith.mulf %4, %5 : vector<32x2xf32>
    %7 = vector.extract_strided_slice %0 {offsets = [0, 1], sizes = [32, 1], strides = [1, 1]} : vector<32x5xf32> to vector<32x1xf32>
    %8 = vector.extract_strided_slice %1 {offsets = [1, 0], sizes = [1, 2], strides = [1, 1]} : vector<5x2xf32> to vector<1x2xf32>
    %9 = vector.broadcast %7 : vector<32x1xf32> to vector<32x2xf32>
    %10 = vector.broadcast %8 : vector<1x2xf32> to vector<32x2xf32>
    %11 = arith.mulf %9, %10 : vector<32x2xf32>
    %12 = arith.addf %6, %11 : vector<32x2xf32>
    %13 = vector.extract_strided_slice %0 {offsets = [0, 2], sizes = [32, 1], strides = [1, 1]} : vector<32x5xf32> to vector<32x1xf32>
    %14 = vector.extract_strided_slice %1 {offsets = [2, 0], sizes = [1, 2], strides = [1, 1]} : vector<5x2xf32> to vector<1x2xf32>
    %15 = vector.broadcast %13 : vector<32x1xf32> to vector<32x2xf32>
    %16 = vector.broadcast %14 : vector<1x2xf32> to vector<32x2xf32>
    %17 = arith.mulf %15, %16 : vector<32x2xf32>
    %18 = arith.addf %12, %17 : vector<32x2xf32>
    %19 = vector.extract_strided_slice %0 {offsets = [0, 3], sizes = [32, 1], strides = [1, 1]} : vector<32x5xf32> to vector<32x1xf32>
    %20 = vector.extract_strided_slice %1 {offsets = [3, 0], sizes = [1, 2], strides = [1, 1]} : vector<5x2xf32> to vector<1x2xf32>
    %21 = vector.broadcast %19 : vector<32x1xf32> to vector<32x2xf32>
    %22 = vector.broadcast %20 : vector<1x2xf32> to vector<32x2xf32>
    %23 = arith.mulf %21, %22 : vector<32x2xf32>
    %24 = arith.addf %18, %23 : vector<32x2xf32>
    %25 = vector.extract_strided_slice %0 {offsets = [0, 4], sizes = [32, 1], strides = [1, 1]} : vector<32x5xf32> to vector<32x1xf32>
    %26 = vector.extract_strided_slice %1 {offsets = [4, 0], sizes = [1, 2], strides = [1, 1]} : vector<5x2xf32> to vector<1x2xf32>
    %27 = vector.broadcast %25 : vector<32x1xf32> to vector<32x2xf32>
    %28 = vector.broadcast %26 : vector<1x2xf32> to vector<32x2xf32>
    %29 = arith.mulf %27, %28 : vector<32x2xf32>
    %30 = arith.addf %24, %29 : vector<32x2xf32>
    %c0_3 = arith.constant 0 : index
    %c0_4 = arith.constant 0 : index
    %31 = vector.load %arg3[%c0_3, %c0_4] : memref<1x2xf32, #tpu.memory_space<vmem>>, vector<1x2xf32>
    %32 = vector.broadcast %31 : vector<1x2xf32> to vector<32x2xf32>
    %33 = arith.addf %30, %32 : vector<32x2xf32>
    %c0_5 = arith.constant 0 : index
    %c0_6 = arith.constant 0 : index
    %34 = vector.load %arg9[%c0_5, %c0_6] : memref<32x2xf32, #tpu.memory_space<vmem>>, vector<32x2xf32>
    tpu.vector_store %arg9[%c0_5, %c0_6], %33 {strides = array<i32>} : memref<32x2xf32, #tpu.memory_space<vmem>>, vector<32x2xf32>,
    %c0_7 = arith.constant 0 : index
    %c0_8 = arith.constant 0 : index
    %35 = vector.load %arg2[%c0_7, %c0_8] : memref<2x2xf32, #tpu.memory_space<vmem>>, vector<2x2xf32>
    %c0_9 = arith.constant 0 : index
    %c0_10 = arith.constant 0 : index
    %36 = tpu.strided_load %arg9[%c0_9, %c0_10] {strides = array<i32: 8, 1>} : memref<32x2xf32, #tpu.memory_space<vmem>>, vector<4x2xf32>
    %37 = math.tanh %36 : vector<4x2xf32>
    %38 = vector.extract_strided_slice %37 {offsets = [0, 0], sizes = [4, 1], strides = [1, 1]} : vector<4x2xf32> to vector<4x1xf32>
    %39 = vector.extract_strided_slice %35 {offsets = [0, 0], sizes = [1, 2], strides = [1, 1]} : vector<2x2xf32> to vector<1x2xf32>
    %40 = vector.broadcast %38 : vector<4x1xf32> to vector<4x2xf32>
    %41 = vector.broadcast %39 : vector<1x2xf32> to vector<4x2xf32>
    %42 = arith.mulf %40, %41 : vector<4x2xf32>
    %43 = vector.extract_strided_slice %37 {offsets = [0, 1], sizes = [4, 1], strides = [1, 1]} : vector<4x2xf32> to vector<4x1xf32>
    %44 = vector.extract_strided_slice %35 {offsets = [1, 0], sizes = [1, 2], strides = [1, 1]} : vector<2x2xf32> to vector<1x2xf32>
    %45 = vector.broadcast %43 : vector<4x1xf32> to vector<4x2xf32>
    %46 = vector.broadcast %44 : vector<1x2xf32> to vector<4x2xf32>
    %47 = arith.mulf %45, %46 : vector<4x2xf32>
    %48 = arith.addf %42, %47 : vector<4x2xf32>
    %c1 = arith.constant 1 : index
    %c0_11 = arith.constant 0 : index
    %49 = tpu.strided_load %arg9[%c1, %c0_11] {strides = array<i32: 8, 1>} : memref<32x2xf32, #tpu.memory_space<vmem>>, vector<4x2xf32>
    %50 = arith.addf %49, %48 : vector<4x2xf32>
    %51 = math.tanh %50 : vector<4x2xf32>
    %52 = vector.extract_strided_slice %51 {offsets = [0, 0], sizes = [4, 1], strides = [1, 1]} : vector<4x2xf32> to vector<4x1xf32>
    %53 = vector.extract_strided_slice %35 {offsets = [0, 0], sizes = [1, 2], strides = [1, 1]} : vector<2x2xf32> to vector<1x2xf32>
    %54 = vector.broadcast %52 : vector<4x1xf32> to vector<4x2xf32>
    %55 = vector.broadcast %53 : vector<1x2xf32> to vector<4x2xf32>
    %56 = arith.mulf %54, %55 : vector<4x2xf32>
    %57 = vector.extract_strided_slice %51 {offsets = [0, 1], sizes = [4, 1], strides = [1, 1]} : vector<4x2xf32> to vector<4x1xf32>
    %58 = vector.extract_strided_slice %35 {offsets = [1, 0], sizes = [1, 2], strides = [1, 1]} : vector<2x2xf32> to vector<1x2xf32>
    %59 = vector.broadcast %57 : vector<4x1xf32> to vector<4x2xf32>
    %60 = vector.broadcast %58 : vector<1x2xf32> to vector<4x2xf32>
    %61 = arith.mulf %59, %60 : vector<4x2xf32>
    %62 = arith.addf %56, %61 : vector<4x2xf32>
    %c2 = arith.constant 2 : index
    %c0_12 = arith.constant 0 : index
    %63 = tpu.strided_load %arg9[%c2, %c0_12] {strides = array<i32: 8, 1>} : memref<32x2xf32, #tpu.memory_space<vmem>>, vector<4x2xf32>
    %64 = arith.addf %63, %62 : vector<4x2xf32>
    %65 = math.tanh %64 : vector<4x2xf32>
    %66 = vector.extract_strided_slice %65 {offsets = [0, 0], sizes = [4, 1], strides = [1, 1]} : vector<4x2xf32> to vector<4x1xf32>
    %67 = vector.extract_strided_slice %35 {offsets = [0, 0], sizes = [1, 2], strides = [1, 1]} : vector<2x2xf32> to vector<1x2xf32>
    %68 = vector.broadcast %66 : vector<4x1xf32> to vector<4x2xf32>
    %69 = vector.broadcast %67 : vector<1x2xf32> to vector<4x2xf32>
    %70 = arith.mulf %68, %69 : vector<4x2xf32>
    %71 = vector.extract_strided_slice %65 {offsets = [0, 1], sizes = [4, 1], strides = [1, 1]} : vector<4x2xf32> to vector<4x1xf32>
    %72 = vector.extract_strided_slice %35 {offsets = [1, 0], sizes = [1, 2], strides = [1, 1]} : vector<2x2xf32> to vector<1x2xf32>
    %73 = vector.broadcast %71 : vector<4x1xf32> to vector<4x2xf32>
    %74 = vector.broadcast %72 : vector<1x2xf32> to vector<4x2xf32>
    %75 = arith.mulf %73, %74 : vector<4x2xf32>
    %76 = arith.addf %70, %75 : vector<4x2xf32>
    %c3 = arith.constant 3 : index
    %c0_13 = arith.constant 0 : index
    %77 = tpu.strided_load %arg9[%c3, %c0_13] {strides = array<i32: 8, 1>} : memref<32x2xf32, #tpu.memory_space<vmem>>, vector<4x2xf32>
    %78 = arith.addf %77, %76 : vector<4x2xf32>
    %79 = math.tanh %78 : vector<4x2xf32>
    %80 = vector.extract_strided_slice %79 {offsets = [0, 0], sizes = [4, 1], strides = [1, 1]} : vector<4x2xf32> to vector<4x1xf32>
    %81 = vector.extract_strided_slice %35 {offsets = [0, 0], sizes = [1, 2], strides = [1, 1]} : vector<2x2xf32> to vector<1x2xf32>
    %82 = vector.broadcast %80 : vector<4x1xf32> to vector<4x2xf32>
    %83 = vector.broadcast %81 : vector<1x2xf32> to vector<4x2xf32>
    %84 = arith.mulf %82, %83 : vector<4x2xf32>
    %85 = vector.extract_strided_slice %79 {offsets = [0, 1], sizes = [4, 1], strides = [1, 1]} : vector<4x2xf32> to vector<4x1xf32>
    %86 = vector.extract_strided_slice %35 {offsets = [1, 0], sizes = [1, 2], strides = [1, 1]} : vector<2x2xf32> to vector<1x2xf32>
    %87 = vector.broadcast %85 : vector<4x1xf32> to vector<4x2xf32>
    %88 = vector.broadcast %86 : vector<1x2xf32> to vector<4x2xf32>
    %89 = arith.mulf %87, %88 : vector<4x2xf32>
    %90 = arith.addf %84, %89 : vector<4x2xf32>
    %c4 = arith.constant 4 : index
    %c0_14 = arith.constant 0 : index
    %91 = tpu.strided_load %arg9[%c4, %c0_14] {strides = array<i32: 8, 1>} : memref<32x2xf32, #tpu.memory_space<vmem>>, vector<4x2xf32>
    %92 = arith.addf %91, %90 : vector<4x2xf32>
    %93 = math.tanh %92 : vector<4x2xf32>
    %94 = vector.extract_strided_slice %93 {offsets = [0, 0], sizes = [4, 1], strides = [1, 1]} : vector<4x2xf32> to vector<4x1xf32>
    %95 = vector.extract_strided_slice %35 {offsets = [0, 0], sizes = [1, 2], strides = [1, 1]} : vector<2x2xf32> to vector<1x2xf32>
    %96 = vector.broadcast %94 : vector<4x1xf32> to vector<4x2xf32>
    %97 = vector.broadcast %95 : vector<1x2xf32> to vector<4x2xf32>
    %98 = arith.mulf %96, %97 : vector<4x2xf32>
    %99 = vector.extract_strided_slice %93 {offsets = [0, 1], sizes = [4, 1], strides = [1, 1]} : vector<4x2xf32> to vector<4x1xf32>
    %100 = vector.extract_strided_slice %35 {offsets = [1, 0], sizes = [1, 2], strides = [1, 1]} : vector<2x2xf32> to vector<1x2xf32>
    %101 = vector.broadcast %99 : vector<4x1xf32> to vector<4x2xf32>
    %102 = vector.broadcast %100 : vector<1x2xf32> to vector<4x2xf32>
    %103 = arith.mulf %101, %102 : vector<4x2xf32>
    %104 = arith.addf %98, %103 : vector<4x2xf32>
    %c5 = arith.constant 5 : index
    %c0_15 = arith.constant 0 : index
    %105 = tpu.strided_load %arg9[%c5, %c0_15] {strides = array<i32: 8, 1>} : memref<32x2xf32, #tpu.memory_space<vmem>>, vector<4x2xf32>
    %106 = arith.addf %105, %104 : vector<4x2xf32>
    %107 = math.tanh %106 : vector<4x2xf32>
    %108 = vector.extract_strided_slice %107 {offsets = [0, 0], sizes = [4, 1], strides = [1, 1]} : vector<4x2xf32> to vector<4x1xf32>
    %109 = vector.extract_strided_slice %35 {offsets = [0, 0], sizes = [1, 2], strides = [1, 1]} : vector<2x2xf32> to vector<1x2xf32>
    %110 = vector.broadcast %108 : vector<4x1xf32> to vector<4x2xf32>
    %111 = vector.broadcast %109 : vector<1x2xf32> to vector<4x2xf32>
    %112 = arith.mulf %110, %111 : vector<4x2xf32>
    %113 = vector.extract_strided_slice %107 {offsets = [0, 1], sizes = [4, 1], strides = [1, 1]} : vector<4x2xf32> to vector<4x1xf32>
    %114 = vector.extract_strided_slice %35 {offsets = [1, 0], sizes = [1, 2], strides = [1, 1]} : vector<2x2xf32> to vector<1x2xf32>
    %115 = vector.broadcast %113 : vector<4x1xf32> to vector<4x2xf32>
    %116 = vector.broadcast %114 : vector<1x2xf32> to vector<4x2xf32>
    %117 = arith.mulf %115, %116 : vector<4x2xf32>
    %118 = arith.addf %112, %117 : vector<4x2xf32>
    %c6 = arith.constant 6 : index
    %c0_16 = arith.constant 0 : index
    %119 = tpu.strided_load %arg9[%c6, %c0_16] {strides = array<i32: 8, 1>} : memref<32x2xf32, #tpu.memory_space<vmem>>, vector<4x2xf32>
    %120 = arith.addf %119, %118 : vector<4x2xf32>
    %121 = math.tanh %120 : vector<4x2xf32>
    %122 = vector.extract_strided_slice %121 {offsets = [0, 0], sizes = [4, 1], strides = [1, 1]} : vector<4x2xf32> to vector<4x1xf32>
    %123 = vector.extract_strided_slice %35 {offsets = [0, 0], sizes = [1, 2], strides = [1, 1]} : vector<2x2xf32> to vector<1x2xf32>
    %124 = vector.broadcast %122 : vector<4x1xf32> to vector<4x2xf32>
    %125 = vector.broadcast %123 : vector<1x2xf32> to vector<4x2xf32>
    %126 = arith.mulf %124, %125 : vector<4x2xf32>
    %127 = vector.extract_strided_slice %121 {offsets = [0, 1], sizes = [4, 1], strides = [1, 1]} : vector<4x2xf32> to vector<4x1xf32>
    %128 = vector.extract_strided_slice %35 {offsets = [1, 0], sizes = [1, 2], strides = [1, 1]} : vector<2x2xf32> to vector<1x2xf32>
    %129 = vector.broadcast %127 : vector<4x1xf32> to vector<4x2xf32>
    %130 = vector.broadcast %128 : vector<1x2xf32> to vector<4x2xf32>
    %131 = arith.mulf %129, %130 : vector<4x2xf32>
    %132 = arith.addf %126, %131 : vector<4x2xf32>
    %c7 = arith.constant 7 : index
    %c0_17 = arith.constant 0 : index
    %133 = tpu.strided_load %arg9[%c7, %c0_17] {strides = array<i32: 8, 1>} : memref<32x2xf32, #tpu.memory_space<vmem>>, vector<4x2xf32>
    %134 = arith.addf %133, %132 : vector<4x2xf32>
    %135 = math.tanh %134 : vector<4x2xf32>
    %cst = arith.constant 0.000000e+00 : f32
    %136 = vector.broadcast %cst : f32 to vector<4x2xf32>
    %137 = arith.maximumf %135, %136 : vector<4x2xf32>
    %c0_18 = arith.constant 0 : index
    %c0_19 = arith.constant 0 : index
    %138 = vector.load %arg4[%c0_18, %c0_19] : memref<2x128xf32, #tpu.memory_space<vmem>>, vector<2x128xf32>
    %c0_20 = arith.constant 0 : index
    %c0_21 = arith.constant 0 : index
    %139 = vector.load %arg5[%c0_20, %c0_21] : memref<1x128xf32, #tpu.memory_space<vmem>>, vector<1x128xf32>
    %140 = vector.extract_strided_slice %137 {offsets = [0, 0], sizes = [4, 1], strides = [1, 1]} : vector<4x2xf32> to vector<4x1xf32>
    %141 = vector.extract_strided_slice %138 {offsets = [0, 0], sizes = [1, 128], strides = [1, 1]} : vector<2x128xf32> to vector<1x128xf32>
    %142 = vector.broadcast %140 : vector<4x1xf32> to vector<4x128xf32>
    %143 = vector.broadcast %141 : vector<1x128xf32> to vector<4x128xf32>
    %144 = arith.mulf %142, %143 : vector<4x128xf32>
    %145 = vector.broadcast %139 : vector<1x128xf32> to vector<4x128xf32>
    %146 = arith.addf %145, %144 : vector<4x128xf32>
    %147 = vector.extract_strided_slice %137 {offsets = [0, 1], sizes = [4, 1], strides = [1, 1]} : vector<4x2xf32> to vector<4x1xf32>
    %148 = vector.extract_strided_slice %138 {offsets = [1, 0], sizes = [1, 128], strides = [1, 1]} : vector<2x128xf32> to vector<1x128xf32>
    %149 = vector.broadcast %147 : vector<4x1xf32> to vector<4x128xf32>
    %150 = vector.broadcast %148 : vector<1x128xf32> to vector<4x128xf32>
    %151 = arith.mulf %149, %150 : vector<4x128xf32>
    %152 = arith.addf %146, %151 : vector<4x128xf32>
    %cst_22 = arith.constant 0.000000e+00 : f32
    %153 = vector.broadcast %cst_22 : f32 to vector<4x128xf32>
    %154 = arith.maximumf %152, %153 : vector<4x128xf32>
    %c0_23 = arith.constant 0 : index
    %c0_24 = arith.constant 0 : index
    %155 = vector.load %arg6[%c0_23, %c0_24] : memref<1x128xf32, #tpu.memory_space<vmem>>, vector<1x128xf32>
    %156 = vector.broadcast %155 : vector<1x128xf32> to vector<4x128xf32>
    %157 = arith.mulf %154, %156 : vector<4x128xf32>
    %cst_25 = arith.constant dense<0.000000e+00> : vector<4xf32>
    %158 = vector.multi_reduction <add>, %157, %cst_25 [1] : vector<4x128xf32> to vector<4xf32>
    %159 = vector.shape_cast %158 : vector<4xf32> to vector<4x1xf32>
    %c0_26 = arith.constant 0 : index
    %c0_27 = arith.constant 0 : index
    %160 = memref.load %arg7[%c0_26, %c0_27] : memref<1x1xf32, #tpu.memory_space<smem>>
    %161 = vector.broadcast %160 : f32 to vector<4x1xf32>
    %162 = arith.addf %159, %161 : vector<4x1xf32>
    %c0_28 = arith.constant 0 : index
    %c0_29 = arith.constant 0 : index
    %163 = vector.load %arg8[%c0_28, %c0_29] : memref<4x1xf32, #tpu.memory_space<vmem>>, vector<4x1xf32>
    tpu.vector_store %arg8[%c0_28, %c0_29], %162 {strides = array<i32>} : memref<4x1xf32, #tpu.memory_space<vmem>>, vector<4x1xf32>,
    return
  }
}

</mosaic_0001>

<bundles_post_ra>
// kernel: tpu_custom_call.1
= control target key start
LH: loop header
LB: loop body
LE: loop exit
PB: predicated region body
PF: predicated region fallthrough
CT: control target
= control target key end

     0   :  { %v412_v0 = vmov 0   ;;  %v413_v5 = vmov 1   ;;  %v414_v6 = vmov 2   ;;  %v415_v7 = vmov 3   ;;  %s546_s0 = inlined_call_operand.vmem [shape: f32[32,5], index: 0, kind: input, shape index: {}]   ;;  %s547_s1 = inlined_call_operand.vmem [shape: f32[5,2], index: 1, kind: input, shape index: {}]   ;;  %s548_s3 = inlined_call_operand.vmem [shape: f32[1,2], index: 3, kind: input, shape index: {}]   ;;  %s549_s2 = inlined_call_operand.vmem [shape: f32[2,2], index: 2, kind: input, shape index: {}]   ;;  %s550_s4 = inlined_call_operand.vmem [shape: f32[2,128], index: 4, kind: input, shape index: {}]   ;;  %s551_s5 = inlined_call_operand.vmem [shape: f32[1,128], index: 5, kind: input, shape index: {}]   ;;  %s552_s6 = inlined_call_operand.vmem [shape: f32[1,128], index: 6, kind: input, shape index: {}]   ;;  %s553_s7 = inlined_call_operand.<no memory space> [shape: f32[1,1], index: 7, kind: input, shape index: {}]   ;;  %s554_s8 = inlined_call_operand.vmem [shape: f32[4,1], index: 8, kind: output, shape index: {}]  }
   0x1   :  { %375 = vset.pattern.permute.xlu1 %v412_v0  ;;  %374 = vset.pattern.permute.xlu0 %v412_v0  ;;  %v32_v1 = vld [vmem:[%s546_s0 + $0x10] sm:$0xff]  ;;  %v30_v2 = vld [vmem:[%s546_s0] sm:$0xff]  ;;  %v33_v3 = vld [vmem:[%s546_s0 + $0x18] sm:$0xff]  ;;  %v416_v8 = vmov 4   ;;  %v55_v15 = vlaneseq  ;;  %vm186_vm0 = vcmask 15360   ;;  %vm353_vm1 = vcmask 1043456  }
   0x2   :  { %47 = vperm.xlu1 %375, %v32_v1   ;;  %37 = vperm.xlu0 %374, %v30_v2   ;;  %v31_v4 = vld [vmem:[%s546_s0 + $0x8] sm:$0xff]  ;;  %v34_v24 = vld [vmem:[%s547_s1] sm:$0x1f]  ;;  %vm360_vm2 = vcmask 3072  }
   0x3   :  { %v56_v18 = vshrl.u32 %v55_v15, 7  ;;  %v366_v50 = vld [vmem:[%s548_s3] ss:$0 sm:$0xff] }
   0x5   :  { %v480_v19 = vsub.s32 1, %v56_v18  ;;  %v482_v22 = vsub.s32 0, %v56_v18  ;;  %v109_v23 = vsub.s32 2, %v56_v18  ;;  %v165_v30 = vsub.s32 4, %v56_v18 }
   0x6   :  { %52 = vperm.xlu1 %375, %v33_v3   ;;  %42 = vperm.xlu0 %374, %v31_v4   ;;  %v137_v33 = vsub.s32 3, %v56_v18 }
   0x7   :  { %v82_v25 = vrot.slane %v34_v24, %v480_v19  ;;  %v58_v28 = vrot.slane %v34_v24, %v482_v22  ;;  %v110_v29 = vrot.slane %v34_v24, %v109_v23  ;;  %v166_v37 = vrot.slane %v34_v24, %v165_v30 }
   0x8   :  { %v138_v39 = vrot.slane %v34_v24, %v137_v33 }
   0xa   :  { %377 = vset.pattern.permute.xlu1 %v413_v5  ;;  %376 = vset.pattern.permute.xlu0 %v413_v5 }
   0xb   :  { %68 = vperm.xlu1 %377, %v31_v4   ;;  %64 = vperm.xlu0 %376, %v30_v2  }
   0xf   :  { %72 = vperm.xlu1 %377, %v32_v1   ;;  %76 = vperm.xlu0 %376, %v33_v3  }
  0x13   :  { %378 = vset.pattern.permute.xlu1 %v414_v6  ;;  %379 = vset.pattern.permute.xlu0 %v414_v6 }
  0x14   :  { %92 = vperm.xlu1 %378, %v30_v2   ;;  %96 = vperm.xlu0 %379, %v31_v4  }
  0x18   :  { %100 = vperm.xlu1 %378, %v32_v1   ;;  %380 = vset.pattern.permute.xlu0 %v415_v7 }
  0x19   :  { %120 = vperm.xlu0 %380, %v30_v2  }
  0x1c   :  { %104 = vperm.xlu1 %378, %v33_v3  }
  0x1d   :  { %132 = vperm.xlu0 %380, %v33_v3  }
  0x20   :  { %381 = vset.pattern.permute.xlu1 %v415_v7 }
  0x21   :  { %124 = vperm.xlu1 %381, %v31_v4   ;;  %383 = vset.pattern.permute.xlu0 %v416_v8 }
  0x22   :  { %152 = vperm.xlu0 %383, %v31_v4  }
  0x25   :  { %128 = vperm.xlu1 %381, %v32_v1  }
  0x26   :  { %384 = vset.pattern.permute.xlu0 %v412_v0 }
  0x29   :  { %382 = vset.pattern.permute.xlu1 %v416_v8 }
  0x2a   :  { %148 = vperm.xlu1 %382, %v30_v2  }
  0x2e   :  { %156 = vperm.xlu1 %382, %v32_v1  }
  0x32   :  { %160 = vperm.xlu1 %382, %v33_v3  }
  0x36   :  { %385 = vset.pattern.permute.xlu1 %v413_v5 }
  0x81   :  { %v48_v9 = vpop.permute.xlu1 %47  ;;  %v38_v10 = vpop.permute.xlu0 %37 }
  0x82   :  { %v59_v40 = vmul.f32 %v58_v28, %v38_v10  ;;  %v61_v55 = vmul.f32 %v58_v28, %v48_v9 }
  0x85   :  { %v53_v11 = vpop.permute.xlu1 %52  ;;  %v43_v12 = vpop.permute.xlu0 %42 }
  0x86   :  { %v60_v31 = vmul.f32 %v58_v28, %v43_v12  ;;  %v62_v60 = vmul.f32 %v58_v28, %v53_v11 }
  0x8a   :  { %v69_v13 = vpop.permute.xlu1 %68  ;;  %v65_v14 = vpop.permute.xlu0 %64 }
  0x8b   :  { %v84_v32 = vmul.f32 %v82_v25, %v69_v13  ;;  %v83_v41 = vmul.f32 %v82_v25, %v65_v14 }
  0x8d   :  { %v88_v38 = vadd.f32 %v84_v32, %v60_v31  ;;  %v87_v48 = vadd.f32 %v83_v41, %v59_v40 }
  0x8e   :  { %v73_v16 = vpop.permute.xlu1 %72  ;;  %v77_v17 = vpop.permute.xlu0 %76 }
  0x8f   :  { %v85_v52 = vmul.f32 %v82_v25, %v73_v16  ;;  %v86_v57 = vmul.f32 %v82_v25, %v77_v17  ;;  %v191_v25 = vld [vmem:[%s549_s2] sm:$0x3] }
  0x91   :  { %v89_v61 = vadd.f32 %v85_v52, %v61_v55  ;;  %v90_v4 = vadd.f32 %v86_v57, %v62_v60 }
  0x93   :  { %v93_v20 = vpop.permute.xlu1 %92  ;;  %v97_v21 = vpop.permute.xlu0 %96 }
  0x94   :  { %v112_v36 = vmul.f32 %v110_v29, %v97_v21  ;;  %v111_v49 = vmul.f32 %v110_v29, %v93_v20 }
  0x96   :  { %v116_v43 = vadd.f32 %v112_v36, %v88_v38  ;;  %v115_v58 = vadd.f32 %v111_v49, %v87_v48 }
  0x97   :  { %v101_v26 = vpop.permute.xlu1 %100 }
  0x98   :  { %v121_v27 = vpop.permute.xlu0 %120  ;;  %v113_v59 = vmul.f32 %v110_v29, %v101_v26  ;;  %v502_v26 = vrot.slane %v191_v25, %v482_v22 }
  0x99   :  { %v139_v54 = vmul.f32 %v138_v39, %v121_v27  ;;  %v505_v27 = vrot.slane %v191_v25, %v480_v19 }
  0x9a   :  { %v117_v6 = vadd.f32 %v113_v59, %v89_v61 }
  0x9b   :  { %v105_v34 = vpop.permute.xlu1 %104  ;;  %v143_v63 = vadd.f32 %v139_v54, %v115_v58 }
  0x9c   :  { %v133_v35 = vpop.permute.xlu0 %132  ;;  %v114_v1 = vmul.f32 %v110_v29, %v105_v34 }
  0x9d   :  { %v142_v8 = vmul.f32 %v138_v39, %v133_v35 }
  0x9e   :  { %v118_v12 = vadd.f32 %v114_v1, %v90_v4 }
  0xa0   :  { %v125_v42 = vpop.permute.xlu1 %124  ;;  %v146_v16 = vadd.f32 %v142_v8, %v118_v12 }
  0xa1   :  { %v140_v44 = vmul.f32 %v138_v39, %v125_v42  ;;  %v153_v45 = vpop.permute.xlu0 %152 }
  0xa2   :  { %v168_v46 = vmul.f32 %v166_v37, %v153_v45 }
  0xa3   :  { %v144_v47 = vadd.f32 %v140_v44, %v116_v43 }
  0xa4   :  { %v129_v51 = vpop.permute.xlu1 %128 }
  0xa5   :  { %v172_v53 = vadd.f32 %v168_v46, %v144_v47  ;;  %v141_v2 = vmul.f32 %v138_v39, %v129_v51 }
  0xa7   :  { %v183_v56 = vadd.f32 %v366_v50, %v172_v53  ;;  %v145_v9 = vadd.f32 %v141_v2, %v117_v6 }
  0xa9   :  { %188 = vst.msk [vmem:[#allocation2 + $0x8] sm:$0xff] %vm186_vm0, %v183_v56  ;;  %v149_v62 = vpop.permute.xlu1 %148 }
  0xaa   :  { %v167_v3 = vmul.f32 %v166_v37, %v149_v62 }
  0xac   :  { %v171_v7 = vadd.f32 %v167_v3, %v143_v63 }
  0xad   :  { %v157_v10 = vpop.permute.xlu1 %156 }
  0xae   :  { %v182_v13 = vadd.f32 %v366_v50, %v171_v7  ;;  %v169_v14 = vmul.f32 %v166_v37, %v157_v10 }
  0xb0   :  { %187 = vst.msk [vmem:[#allocation2] sm:$0xff] %vm186_vm0, %v182_v13  ;;  %v173_v11 = vadd.f32 %v169_v14, %v145_v9 }
  0xb1   :  { %v161_v15 = vpop.permute.xlu1 %160 }
  0xb2   :  { %v184_v17 = vadd.f32 %v366_v50, %v173_v11  ;;  %v170_v18 = vmul.f32 %v166_v37, %v161_v15 }
  0xb4   :  { %189 = vst.msk [vmem:[#allocation2 + $0x10] sm:$0xff] %vm186_vm0, %v184_v17  ;;  %v174_v20 = vadd.f32 %v170_v18, %v146_v16 }
  0xb6   :  { %v185_v21 = vadd.f32 %v366_v50, %v174_v20 }
  0xb8   :  { %190 = vst.msk [vmem:[#allocation2 + $0x18] sm:$0xff] %vm186_vm0, %v185_v21 }
  0xbf   :  { %v192_v23 = vld [vmem:[#allocation2] ss:$8 sm:$0xf]  ;;  %v215_v33 = vld [vmem:[#allocation2 + $0x1] ss:$8 sm:$0xf] }
  0xc0   :  { %396 = vtanh.f32 %v192_v23  ;;  %v231_v41 = vld [vmem:[#allocation2 + $0x2] ss:$8 sm:$0xf]  ;;  %v247_v49 = vld [vmem:[#allocation2 + $0x3] ss:$8 sm:$0xf] }
  0xc1   :  { %v263_v57 = vld [vmem:[#allocation2 + $0x4] ss:$8 sm:$0xf]  ;;  %v279_v2 = vld [vmem:[#allocation2 + $0x5] ss:$8 sm:$0xf] }
  0xc2   :  { %v295_v9 = vld [vmem:[#allocation2 + $0x6] ss:$8 sm:$0xf]  ;;  %v311_v20 = vld [vmem:[#allocation2 + $0x7] ss:$8 sm:$0xf] }
  0xca   :  { %v397_v24 = vpop.eup %396 }
  0xcb   :  { %205 = vperm.xlu1 %385, %v397_v24   ;;  %196 = vperm.xlu0 %384, %v397_v24  }
  0xcf   :  { %386 = vset.pattern.permute.xlu1 %v412_v0  ;;  %387 = vset.pattern.permute.xlu0 %v413_v5 }
 0x14a   :  { %v206_v28 = vpop.permute.xlu1 %205  ;;  %v197_v29 = vpop.permute.xlu0 %196 }
 0x14b   :  { %v212_v30 = vmul.f32 %v505_v27, %v206_v28  ;;  %v203_v31 = vmul.f32 %v502_v26, %v197_v29 }
 0x14d   :  { %v213_v32 = vadd.f32 %v212_v30, %v203_v31 }
 0x14f   :  { %v216_v34 = vadd.f32 %v215_v33, %v213_v32  ;;  %v368_v33 = vld [vmem:[%s552_s6] ss:$0 sm:$0xff] }
 0x151   :  { %398 = vtanh.f32 %v216_v34 }
 0x15b   :  { %v399_v35 = vpop.eup %398 }
 0x15c   :  { %225 = vperm.xlu0 %387, %v399_v35   ;;  %220 = vperm.xlu1 %386, %v399_v35  }
 0x160   :  { %389 = vset.pattern.permute.xlu0 %v412_v0 }
 0x1db   :  { %v226_v36 = vpop.permute.xlu0 %225  ;;  %v221_v37 = vpop.permute.xlu1 %220 }
 0x1dc   :  { %v228_v38 = vmul.f32 %v226_v36, %v505_v27  ;;  %v223_v39 = vmul.f32 %v221_v37, %v502_v26 }
 0x1de   :  { %v229_v40 = vadd.f32 %v228_v38, %v223_v39 }
 0x1e0   :  { %v232_v42 = vadd.f32 %v231_v41, %v229_v40 }
 0x1e2   :  { %400 = vtanh.f32 %v232_v42 }
 0x1ec   :  { %v401_v43 = vpop.eup %400 }
 0x1ed   :  { %236 = vperm.xlu1 %386, %v401_v43  }
 0x1f1   :  { %388 = vset.pattern.permute.xlu1 %v413_v5 }
 0x1f2   :  { %241 = vperm.xlu1 %388, %v401_v43  }
 0x26c   :  { %v237_v44 = vpop.permute.xlu1 %236 }
 0x26d   :  { %v239_v46 = vmul.f32 %v237_v44, %v502_v26 }
 0x271   :  { %v242_v45 = vpop.permute.xlu1 %241 }
 0x272   :  { %v244_v47 = vmul.f32 %v242_v45, %v505_v27 }
 0x274   :  { %v245_v48 = vadd.f32 %v244_v47, %v239_v46 }
 0x276   :  { %v248_v50 = vadd.f32 %v247_v49, %v245_v48 }
 0x278   :  { %402 = vtanh.f32 %v248_v50 }
 0x282   :  { %v403_v51 = vpop.eup %402 }
 0x283   :  { %257 = vperm.xlu1 %388, %v403_v51   ;;  %252 = vperm.xlu0 %389, %v403_v51  }
 0x287   :  { %390 = vset.pattern.permute.xlu1 %v412_v0  ;;  %391 = vset.pattern.permute.xlu0 %v413_v5 }
 0x302   :  { %v258_v52 = vpop.permute.xlu1 %257  ;;  %v253_v53 = vpop.permute.xlu0 %252 }
 0x303   :  { %v260_v54 = vmul.f32 %v258_v52, %v505_v27  ;;  %v255_v55 = vmul.f32 %v253_v53, %v502_v26 }
 0x305   :  { %v261_v56 = vadd.f32 %v260_v54, %v255_v55 }
 0x307   :  { %v264_v58 = vadd.f32 %v263_v57, %v261_v56 }
 0x309   :  { %404 = vtanh.f32 %v264_v58 }
 0x313   :  { %v405_v59 = vpop.eup %404 }
 0x314   :  { %273 = vperm.xlu0 %391, %v405_v59   ;;  %268 = vperm.xlu1 %390, %v405_v59  }
 0x318   :  { %393 = vset.pattern.permute.xlu0 %v412_v0 }
 0x393   :  { %v274_v60 = vpop.permute.xlu0 %273  ;;  %v269_v61 = vpop.permute.xlu1 %268 }
 0x394   :  { %v276_v62 = vmul.f32 %v274_v60, %v505_v27  ;;  %v271_v63 = vmul.f32 %v269_v61, %v502_v26 }
 0x396   :  { %v277_v1 = vadd.f32 %v276_v62, %v271_v63 }
 0x398   :  { %v280_v3 = vadd.f32 %v279_v2, %v277_v1 }
 0x39a   :  { %406 = vtanh.f32 %v280_v3 }
 0x3a4   :  { %v407_v4 = vpop.eup %406 }
 0x3a5   :  { %284 = vperm.xlu1 %390, %v407_v4  }
 0x3a9   :  { %392 = vset.pattern.permute.xlu1 %v413_v5 }
 0x3aa   :  { %289 = vperm.xlu1 %392, %v407_v4  }
 0x424   :  { %v285_v6 = vpop.permute.xlu1 %284 }
 0x425   :  { %v287_v8 = vmul.f32 %v285_v6, %v502_v26 }
 0x429   :  { %v290_v7 = vpop.permute.xlu1 %289 }
 0x42a   :  { %v292_v10 = vmul.f32 %v290_v7, %v505_v27 }
 0x42c   :  { %v293_v12 = vadd.f32 %v292_v10, %v287_v8 }
 0x42e   :  { %v296_v13 = vadd.f32 %v295_v9, %v293_v12 }
 0x430   :  { %408 = vtanh.f32 %v296_v13 }
 0x43a   :  { %v409_v14 = vpop.eup %408 }
 0x43b   :  { %305 = vperm.xlu1 %392, %v409_v14   ;;  %300 = vperm.xlu0 %393, %v409_v14  }
 0x43f   :  { %394 = vset.pattern.permute.xlu1 %v412_v0  ;;  %395 = vset.pattern.permute.xlu0 %v413_v5  ;;  %v315_v0 = vld [vmem:[%s550_s4] sm:$0x3] }
 0x440   :  { %v325_v5 = vrot.slane %v315_v0, %v482_v22  ;;  %v341_v25 = vrot.slane %v315_v0, %v480_v19  ;;  %v358_v19 = vstv %s553_s7 }
 0x4ba   :  { %v306_v11 = vpop.permute.xlu1 %305  ;;  %v301_v15 = vpop.permute.xlu0 %300 }
 0x4bb   :  { %v308_v16 = vmul.f32 %v306_v11, %v505_v27  ;;  %v303_v17 = vmul.f32 %v301_v15, %v502_v26  ;;  %v367_v26 = vld [vmem:[%s551_s5] ss:$0 sm:$0xff] }
 0x4bd   :  { %v309_v18 = vadd.f32 %v308_v16, %v303_v17 }
 0x4bf   :  { %v312_v21 = vadd.f32 %v311_v20, %v309_v18 }
 0x4c1   :  { %410 = vtanh.f32 %v312_v21 }
 0x4cb   :  { %v411_v23 = vpop.eup %410 }
 0x4cc   :  { %v314_v24 = vmax.f32 %v411_v23, 0.0 }
 0x4ce   :  { %335 = vperm.xlu0 %395, %v314_v24   ;;  %319 = vperm.xlu1 %394, %v314_v24  }
 0x54d   :  { %v336_v28 = vpop.permute.xlu0 %335  ;;  %v320_v27 = vpop.permute.xlu1 %319 }
 0x54e   :  { %v326_v29 = vmul.f32 %v325_v5, %v320_v27  ;;  %v342_v30 = vmul.f32 %v341_v25, %v336_v28 }
 0x550   :  { %v333_v31 = vadd.f32 %v367_v26, %v326_v29 }
 0x552   :  { %v343_v32 = vadd.f32 %v342_v30, %v333_v31 }
 0x554   :  { %v344_v34 = vmax.f32 %v343_v32, 0.0 }
 0x556   :  { %v352_v35 = vmul.f32 %v368_v33, %v344_v34 }
 0x558   :  { %v354_v22 = vsel %vm353_vm1, %v352_v35, 0.0 }
 0x559   :  { %355 = vadd.xlane.f32.xlu1 %v354_v22 }
 0x5e6   :  { %v356_v36 = vpop.xlane.xlu1 %355 }
 0x5e7   :  { %v359_v37 = vadd.f32 %v358_v19, %v356_v36 }
 0x5e9   :  { %361 = vst.msk [vmem:[%s554_s8] sm:$0xf] %vm360_vm2, %v359_v37 }

</bundles_post_ra>
